<compile_context>
chip_gen: v7x
topology: tpu7x:2x2x1
jax: 0.10.0
libtpu: 0.0.40
codegen_flags: <defaults>
</compile_context>

<pallas_src>
import jax
import jax.numpy as jnp
from jax.experimental import pallas as pl
from jax.experimental.pallas import tpu as pltpu

LANE = 128     # TPU vreg lane width
SUBLANE = 8    # TPU vreg sublane count


def _round_up(x, m):
    return ((x + m - 1) // m) * m


def _cdiv(a, b):
    return -(-a // b)


def tagger_kernel(ids_ref, emb_ref, w_ref, b_ref, out_ref):
    # ids_ref : (tile_s, 1)     int32  token ids for this sequence tile
    # emb_ref : (V_pad, E_pad)  f32/bf16  VMEM-resident embedding table
    # w_ref   : (E_pad, Y_pad)  f32/bf16  padded W^T
    # b_ref   : (1, Y_pad)      f32    padded bias (-1e30 in padded label lanes)
    # out_ref : (tile_s, Y_pad) f32    softmax probabilities
    ids = ids_ref[...]                      # (tile_s, 1)
    tile_s = ids.shape[0]
    v_pad = emb_ref.shape[0]

    # Embedding gather as a one-hot MXU matmul (table is VMEM resident, so
    # this is pure on-chip work; one tall matmul instead of tile_s row DMAs).
    onehot = (ids == jax.lax.broadcasted_iota(jnp.int32, (tile_s, v_pad), 1))
    onehot = onehot.astype(emb_ref.dtype)   # 0/1, exact in bf16 too
    x = jnp.dot(onehot, emb_ref[...], preferred_element_type=jnp.float32)

    # Linear projection (MXU) + bias.
    logits = jnp.dot(x.astype(w_ref.dtype), w_ref[...],
                     preferred_element_type=jnp.float32) + b_ref[...]

    # Numerically stable softmax over the label axis, all in f32 (VPU/EUP).
    # Padded label lanes carry a -1e30 bias -> exp underflows to exactly 0.
    m = jnp.max(logits, axis=-1, keepdims=True)
    e = jnp.exp(logits - m)
    denom = jnp.sum(e, axis=-1, keepdims=True)
    out_ref[...] = (e / denom).astype(out_ref.dtype)   # exact divide: rows sum to 1


def pad_tagger_params(emb_table, w_t, bias, *, compute_dtype=jnp.float32):
    """Pad parameters ONCE at load time (hoisted out of the per-call path).

    emb_table: (V, E); w_t: (E, Y) == W.T of nn.Linear; bias: (Y,).
    compute_dtype: MXU operand dtype (bf16 recommended on v6e/v7x).
    """
    V, E = emb_table.shape
    E2, Y = w_t.shape
    assert E2 == E
    V_pad = _round_up(V, LANE)   # lane-dense contraction dim for one-hot gather
    E_pad = _round_up(E, LANE)
    Y_pad = _round_up(Y, LANE)

    emb_p = jnp.zeros((V_pad, E_pad), compute_dtype).at[:V, :E].set(
        emb_table.astype(compute_dtype))
    w_p = jnp.zeros((E_pad, Y_pad), compute_dtype).at[:E, :Y].set(
        w_t.astype(compute_dtype))
    # Bias stays f32; padded label lanes get -1e30 so softmax zeros them out.
    b_p = jnp.full((1, Y_pad), -1e30, jnp.float32).at[:, :Y].set(
        bias.astype(jnp.float32).reshape(1, Y))
    return emb_p, w_p, b_p, (V, E, Y)


def tagger_forward(text, emb_p, w_p, b_p, *, num_y, vocab_size, tile_s_max=1024):
    """text: (S,) int token ids; emb_p/w_p/b_p from pad_tagger_params."""
    S = int(text.shape[0])
    V_pad, E_pad = emb_p.shape
    Y_pad = w_p.shape[1]

    # --- Tiling: one grid step per sequence tile (no per-token axis). -------
    S8 = _round_up(max(S, 1), SUBLANE)
    n_tiles = max(1, _cdiv(S8, tile_s_max))
    if S8 >= 2 * SUBLANE:
        n_tiles = max(n_tiles, 2)          # >=2 parallel tiles for v7x's 2 TCs
    tile_s = _round_up(_cdiv(S8, n_tiles), SUBLANE)
    n_tiles = _cdiv(S8, tile_s)
    S_pad = n_tiles * tile_s

    # Clamp ids (nn.Embedding would raise on OOB; we clamp) and pad the
    # sequence to a whole number of tiles.  (tile_s, 1) blocks keep ids in VMEM.
    ids = jnp.clip(text.astype(jnp.int32), 0, vocab_size - 1)
    ids = jnp.pad(ids, (0, S_pad - S)).reshape(S_pad, 1)

    # --- VMEM budget (explicit, v7x-safe). ----------------------------------
    bpe = jnp.dtype(emb_p.dtype).itemsize
    est = (emb_p.size * bpe + w_p.size * bpe + b_p.size * 4     # resident blocks
           + 2 * (tile_s * 4 + tile_s * Y_pad * 4)              # ids/out (2-buf)
           + 4 * tile_s * max(V_pad, E_pad, Y_pad) * 4)         # intermediates
    vmem_limit = int(min(max(4 * est, 16 << 20), 40 << 20))

    out = pl.pallas_call(
        tagger_kernel,
        out_shape=jax.ShapeDtypeStruct((S_pad, Y_pad), jnp.float32),
        grid=(n_tiles,),
        in_specs=[
            # per-tile token ids
            pl.BlockSpec((tile_s, 1), lambda i: (i, 0)),
            # embedding table / weight / bias: identical block every step ->
            # loaded once, stays resident in VMEM across the grid.
            pl.BlockSpec((V_pad, E_pad), lambda i: (0, 0)),
            pl.BlockSpec((E_pad, Y_pad), lambda i: (0, 0)),
            pl.BlockSpec((1, Y_pad), lambda i: (0, 0)),
        ],
        out_specs=pl.BlockSpec((tile_s, Y_pad), lambda i: (i, 0)),
        compiler_params=pltpu.CompilerParams(
            dimension_semantics=("parallel",),
            vmem_limit_bytes=vmem_limit),
    )(ids, emb_p, w_p, b_p)

    # Strip sequence / label padding.
    return out[:S, :num_y]


if __name__ == "__main__":
    # Small shapes consistent with the module.
    vocab_size = 32
    embed_dim = 16
    hidden_dim = 32   # declared in __init__ but unused by forward()
    num_y = 8
    seq_len = 200     # exercises 2 tiles + sequence padding

    key = jax.random.PRNGKey(0)
    k_emb, k_w, k_b, k_text = jax.random.split(key, 4)

    # Deterministic parameter init (PyTorch-style scales, synthetic values).
    emb_table = jax.random.normal(k_emb, (vocab_size, embed_dim), jnp.float32)
    bound = 1.0 / float(embed_dim) ** 0.5
    w = jax.random.uniform(k_w, (num_y, embed_dim), jnp.float32, -bound, bound)
    b = jax.random.uniform(k_b, (num_y,), jnp.float32, -bound, bound)
    w_t = w.T  # (E, Y)

    text = jax.random.randint(k_text, (seq_len,), 0, vocab_size, jnp.int32)

    # Pure-JAX reference.
    ref = jax.nn.softmax(emb_table[text] @ w_t + b, axis=1)

    # ---- f32 path (matches the PyTorch module numerics) --------------------
    emb_p, w_p, b_p, _ = pad_tagger_params(emb_table, w_t, b,
                                           compute_dtype=jnp.float32)
    out = tagger_forward(text, emb_p, w_p, b_p,
                         num_y=num_y, vocab_size=vocab_size)
    out = jax.block_until_ready(out)
    assert out.shape == (seq_len, num_y)
    assert jnp.allclose(out, ref, atol=2e-3, rtol=2e-3)
    assert jnp.allclose(jnp.sum(out, axis=1), 1.0, atol=1e-4)

    # ---- bf16 MXU-operand path (halves gather/weight HBM bytes, v6e/v7x) ---
    emb_b, w_b, b_b, _ = pad_tagger_params(emb_table, w_t, b,
                                           compute_dtype=jnp.bfloat16)
    out_bf16 = tagger_forward(text, emb_b, w_b, b_b,
                              num_y=num_y, vocab_size=vocab_size)
    out_bf16 = jax.block_until_ready(out_bf16)
    assert jnp.allclose(out_bf16, ref, atol=3e-2, rtol=3e-2)
    assert jnp.allclose(jnp.sum(out_bf16, axis=1), 1.0, atol=1e-3)

    print("KERNEL_OK")
</pallas_src>

<mosaic_0001>
module attributes {stable_mosaic.version = 11 : i64} {
  func.func @tagger_kernel(%arg0: i32, %arg1: memref<104x1xi32, #tpu.memory_space<vmem>>, %arg2: memref<128x128xf32, #tpu.memory_space<vmem>>, %arg3: memref<128x128xf32, #tpu.memory_space<vmem>>, %arg4: memref<1x128xf32, #tpu.memory_space<vmem>>, %arg5: memref<104x128xf32, #tpu.memory_space<vmem>>) attributes {dimension_semantics = [#tpu.dimension_semantics<parallel>], iteration_bounds = array<i64: 2>, scalar_prefetch = 0 : i64, scratch_operands = 0 : i64, tpu.core_type = #tpu.core_type<tc>, window_params = [{transform_indices = @transform_0, window_bounds = array<i64: 104, 1>}, {pipeline_mode = #tpu.pipeline_mode<synchronous>, transform_indices = @transform_1, window_bounds = array<i64: 128, 128>}, {pipeline_mode = #tpu.pipeline_mode<synchronous>, transform_indices = @transform_2, window_bounds = array<i64: 128, 128>}, {pipeline_mode = #tpu.pipeline_mode<synchronous>, transform_indices = @transform_3, window_bounds = array<i64: 1, 128>}, {transform_indices = @transform_4, window_bounds = array<i64: 104, 128>}]} {
    %c0 = arith.constant 0 : index
    %c0_0 = arith.constant 0 : index
    %0 = vector.load %arg1[%c0, %c0_0] : memref<104x1xi32, #tpu.memory_space<vmem>>, vector<104x1xi32>
    %1 = tpu.iota {dimensions = array<i32: 1>} : vector<104x128xi32>
    %2 = vector.broadcast %0 : vector<104x1xi32> to vector<104x128xi32>
    %3 = arith.cmpi eq, %2, %1 : vector<104x128xi32>
    %4 = arith.extui %3 : vector<104x128xi1> to vector<104x128xi32>
    %5 = arith.sitofp %4 : vector<104x128xi32> to vector<104x128xf32>
    %c0_1 = arith.constant 0 : index
    %c0_2 = arith.constant 0 : index
    %6 = vector.load %arg2[%c0_1, %c0_2] : memref<128x128xf32, #tpu.memory_space<vmem>>, vector<128x128xf32>
    %cst = arith.constant dense<0.000000e+00> : vector<104x128xf32>
    %7 = tpu.matmul %5, %6, %cst {dimension_numbers = #tpu.dot_dimension_numbers<[1], [0], [0], [1], [0, 0, 1, 1], [], []>} : vector<104x128xf32>, vector<128x128xf32>, vector<104x128xf32> -> vector<104x128xf32>
    %c0_3 = arith.constant 0 : index
    %c0_4 = arith.constant 0 : index
    %8 = vector.load %arg3[%c0_3, %c0_4] : memref<128x128xf32, #tpu.memory_space<vmem>>, vector<128x128xf32>
    %cst_5 = arith.constant dense<0.000000e+00> : vector<104x128xf32>
    %9 = tpu.matmul %7, %8, %cst_5 {dimension_numbers = #tpu.dot_dimension_numbers<[1], [0], [0], [1], [0, 0, 1, 1], [], []>} : vector<104x128xf32>, vector<128x128xf32>, vector<104x128xf32> -> vector<104x128xf32>
    %c0_6 = arith.constant 0 : index
    %c0_7 = arith.constant 0 : index
    %10 = vector.load %arg4[%c0_6, %c0_7] : memref<1x128xf32, #tpu.memory_space<vmem>>, vector<1x128xf32>
    %11 = vector.broadcast %10 : vector<1x128xf32> to vector<104x128xf32>
    %12 = arith.addf %9, %11 : vector<104x128xf32>
    %cst_8 = arith.constant dense<0xFF800000> : vector<104xf32>
    %13 = vector.multi_reduction <maximumf>, %12, %cst_8 [1] : vector<104x128xf32> to vector<104xf32>
    %14 = vector.shape_cast %13 : vector<104xf32> to vector<104x1xf32>
    %15 = vector.broadcast %14 : vector<104x1xf32> to vector<104x128xf32>
    %16 = arith.subf %12, %15 : vector<104x128xf32>
    %17 = math.exp %16 : vector<104x128xf32>
    %cst_9 = arith.constant dense<0.000000e+00> : vector<104xf32>
    %18 = vector.multi_reduction <add>, %17, %cst_9 [1] : vector<104x128xf32> to vector<104xf32>
    %19 = vector.shape_cast %18 : vector<104xf32> to vector<104x1xf32>
    %20 = vector.broadcast %19 : vector<104x1xf32> to vector<104x128xf32>
    %21 = arith.divf %17, %20 : vector<104x128xf32>
    %c0_10 = arith.constant 0 : index
    %c0_11 = arith.constant 0 : index
    %22 = vector.load %arg5[%c0_10, %c0_11] : memref<104x128xf32, #tpu.memory_space<vmem>>, vector<104x128xf32>
    tpu.vector_store %arg5[%c0_10, %c0_11], %21 {strides = array<i32>} : memref<104x128xf32, #tpu.memory_space<vmem>>, vector<104x128xf32>,
    return
  }
  func.func @transform_0(%arg0: i32) -> (i32, i32) {
    %c0_i32 = arith.constant 0 : i32
    %c0_i32_0 = arith.constant 0 : i32
    return %arg0, %c0_i32 : i32, i32
  }
  func.func @transform_1(%arg0: i32) -> (i32, i32) {
    %c0_i32 = arith.constant 0 : i32
    %c0_i32_0 = arith.constant 0 : i32
    %c0_i32_1 = arith.constant 0 : i32
    return %c0_i32, %c0_i32_0 : i32, i32
  }
  func.func @transform_2(%arg0: i32) -> (i32, i32) {
    %c0_i32 = arith.constant 0 : i32
    %c0_i32_0 = arith.constant 0 : i32
    %c0_i32_1 = arith.constant 0 : i32
    return %c0_i32, %c0_i32_0 : i32, i32
  }
  func.func @transform_3(%arg0: i32) -> (i32, i32) {
    %c0_i32 = arith.constant 0 : i32
    %c0_i32_0 = arith.constant 0 : i32
    %c0_i32_1 = arith.constant 0 : i32
    return %c0_i32, %c0_i32_0 : i32, i32
  }
  func.func @transform_4(%arg0: i32) -> (i32, i32) {
    %c0_i32 = arith.constant 0 : i32
    %c0_i32_0 = arith.constant 0 : i32
    return %arg0, %c0_i32 : i32, i32
  }
}

</mosaic_0001>

<bundles_post_ra>
// kernel: tpu_custom_call.1
= control target key start
LH: loop header
LB: loop body
LE: loop exit
PB: predicated region body
PF: predicated region fallthrough
CT: control target
= control target key end

     0   :  { %9 = vsyncpa [#allocation3], 0  ;;  %s1719_s0 = inlined_call_operand.vmem [shape: s32[208,1], index: 0, kind: input, shape index: {}]   ;;  %s1720_s1 = inlined_call_operand.vmem [shape: f32[128,128], index: 1, kind: input, shape index: {}]   ;;  %s1721_s2 = inlined_call_operand.hbm [shape: f32[128,128], index: 2, kind: input, shape index: {}]   ;;  %s1722_s3 = inlined_call_operand.vmem [shape: f32[1,128], index: 3, kind: input, shape index: {}]   ;;  %s1723_s4 = inlined_call_operand.hbm [shape: f32[208,128], index: 4, kind: output, shape index: {}]  }
   0x1   :  { %10 = vsyncpa [#allocation4], 0 }
   0x2   :  { %12 = vsyncpa [#allocation4 + $0x1], 0  ;;  %s1356_s15 = smov 0   ;;  %s1358_s16 = smov 0  }
   0x3   :  { %s1360_s17 = smov 0   ;;  %s1362_s18 = smov 0  }
   0x4 LB: > { %s1377_s19 = sadd.s32 4294967295, %s1318_s18   ;;  %s824_s20 = sadd.s32 4294967294, %s1318_s18   ;;  %s1318_s18 = sphi %s1362_s18, %s1739_s18   ;;  %s1314_s17 = sphi %s1360_s17, %s1738_s17   ;;  %s1310_s16 = sphi %s1358_s16, %s1737_s16   ;;  %s1306_s15 = sphi %s1356_s15, %s1736_s15  }
   0x5   : > { %s1381_s21 = sadd.s32 1, %s1318_s18   ;;  %s114_s22 = sadd.s32 1, %s1314_s17 }
   0x6   : > { %s111_s23 = ssub.s32 %s1318_s18, %s1381_s21  ;;  %p124_p0 = scmp.ne.s32.totalorder %s1314_s17, %s1310_s16 }
   0x7   : > { %p112_p1 = scmp.eq.s32.totalorder %s111_s23, 0  ;;  %p125_p2 = scmp.eq.s32.totalorder %s1377_s19, 1 }
   0x8   : > { %p130_p3 = scmp.ne.s32.totalorder %s1310_s16, %s1306_s15  ;;  %p131_p4 = scmp.eq.s32.totalorder %s824_s20, 1 }
   0x9   : > { %s1392_s24 = scalar_select %p112_p1, %s1314_s17, %s114_s22  }
   0xa   : > { %p1394_p5 = por %p125_p2, %p124_p0  ;;  %p1398_p6 = por %p131_p4, %p130_p3 }
   0xb   : > { %p825_p7 = scmp.ge.s32.totalorder %s1318_s18, 1  ;;  %p138_p8 = scmp.lt.s32.totalorder %s1318_s18, 3 }
   0xc   : > { %s1727_s25 = scalar_select %p1394_p5, 1, 0 }
   0xd   : > { %s1728_s26 = scalar_select %p1398_p6, 1, 0 }
   0xe   : > { %p1724_p9 = scmp.eq.s32.totalorder %s1377_s19, 0  ;;  %p1405_p10 = pnand %p825_p7, %p138_p8 }
   0xf   : > { %s1320_s28 = smov [#allocation2]   ;;  %s1224_s7 = scalar_lea.hbm %s1721_s2, 2048 }
  0x10   : > { %s1729_s27 = scalar_select %p1405_p10, 1, 0 }
  0x11   : > { %s153_s29 = sshll.u32 %s1320_s28, 4  ;;  %p1117_p11 = pneg %p1405_p10  ;;  %s154_s29 = int_to_ptr.vmem [resolvable:$true] %s153_s29 }
  0x12   : > { %p1225_p13 = scmp.ne.s32.totalorder %s1721_s2, %s1224_s7  ;;  %p1231_p3 = scmp.lt.u32.totalorder %s1224_s7, %s1721_s2 }
  0x13   : > { %p1413_p12 = pnand %p1724_p9, %p1117_p11 }
  0x15   : > { %p1226_p0 = pneg %p1413_p12 }
  0x17   : > { %p1227_p1 = pnand %p1226_p0, %p1225_p13 }
  0x19   : > { %p1228_p2 = pneg %p1227_p1 }
  0x1b   : > { %p1233_p4 = pnand %p1231_p3, %p1228_p2 }
  0x1d   : > { %1236 = shalt.err (!%p1233_p4)
}
  0x1e   : > { %s1237_s12 = scalar_lea.vmem %s154_s29, 2048  ;;  %p1245_p9 = scmp.lt.s32.totalorder %s154_s29, %s154_s29 }
  0x1f   : > { %p1238_p7 = scmp.ne.s32.totalorder %s154_s29, %s1237_s12  ;;  %p1246_p6 = scmp.lt.s32.totalorder %s1237_s12, %s1237_s12 }
  0x21   : > { %p1240_p8 = pnand %p1238_p7, %p1226_p0  ;;  %p1247_p5 = por %p1246_p6, %p1245_p9 }
  0x23   : > { %p1241_p11 = pneg %p1240_p8 }
  0x25   : > { %p1248_p10 = pnand %p1247_p5, %p1241_p11 }
  0x27   : > { %1251 = shalt.err (!%p1248_p10)
}
  0x28   : > { %s1321_s13 = smov 128   ;;  %s1322_s14 = smov 8  }
  0x29   : > { %1120 = dma.hbm_to_vmem [thread:$0]  (!%p1413_p12), %s1721_s2, 2048, %s154_s29, [#allocation3], %s1321_s13, %s1321_s13, %s1322_s14  }
  0x2a   : > { %p1731_p13 = scmp.ne.s32.totalorder %s1729_s27, 0 }
  0x2b   : > { %p1732_p1 = scmp.eq.s32.totalorder (!%p1731_p13), %s1377_s19, 0 }
  0x2c   : > { %181 = sbr.rel (%p1731_p13) target bundleno = 990 (0x3de), region = 36 }
  0x33   : > { %1297 = dma.done.wait (%p1732_p1), [#allocation3], 2048   ;;  %p1733_p0 = pmov %p1732_p1 }
  0x34   : > { %s207_s23 = smul.u32 13, %s1377_s19  ;;  %v1323_v0 = vmov 0   ;;  %v1324_v1 = vmov 0.0|0.0   ;;  %v307_v2 = vld [vmem:[%s1720_s1] sm:$0xff]  ;;  %v308_v3 = vld [vmem:[%s1720_s1 + $0x8] sm:$0xff]  ;;  %v309_v9 = vld [vmem:[%s1720_s1 + $0x10] sm:$0xff] }
  0x35   : > { %1299 = vsyncadd (%p1733_p0), [#allocation3], 4294965248  ;;  %1171 = vset.pattern.permute.xlu1 %v1323_v0  ;;  %1170 = vset.pattern.permute.xlu0 %v1323_v0  ;;  %v1063_v6 = vpack.c.bf16 %v308_v3, %v307_v2  ;;  %vm1325_vm0 = vmmov 0   ;;  %v1326_v10 = vmov 0.0   ;;  %v310_v11 = vld [vmem:[%s1720_s1 + $0x18] sm:$0xff]  ;;  %v311_v12 = vld [vmem:[%s1720_s1 + $0x20] sm:$0xff]  ;;  %v227_v0 = vlaneseq }
  0x36   : > { %p208_p5 = scmp.lt.s32.totalorder %s207_s23, 25  ;;  %1062 = vmatprep.subr.bf16.mxu0 %v1324_v1  ;;  %1086 = vmatprep.subr.bf16.mxu1 %v1324_v1  ;;  %v1066_v13 = vpack.c.bf16 %v310_v11, %v309_v9  ;;  %v312_v14 = vld [vmem:[%s1720_s1 + $0x28] sm:$0xff]  ;;  %v313_v18 = vld [vmem:[%s1720_s1 + $0x30] sm:$0xff]  ;;  %v314_v19 = vld [vmem:[%s1720_s1 + $0x38] sm:$0xff]  ;;  %s204_s6 = sand.u32 1, %s1310_s16  }
  0x37   : > { %1064 = vmatpush3.bf16.msra.mxu0 %v1063_v6  ;;  %952 = vmatprep.mubr.msk.f32.mxu0 %vm1325_vm0, %v1326_v10  ;;  %v1069_v17 = vpack.c.bf16 %v312_v14, %v311_v12  ;;  %v1072_v22 = vpack.c.bf16 %v314_v19, %v313_v18  ;;  %v315_v23 = vld [vmem:[%s1720_s1 + $0x40] sm:$0xff]  ;;  %v316_v24 = vld [vmem:[%s1720_s1 + $0x48] sm:$0xff]  ;;  %v317_v28 = vld [vmem:[%s1720_s1 + $0x50] sm:$0xff]  ;;  %v228_v2 = vand.u32 127, %v227_v0  ;;  %s1110_s7 = smul.u32 104, %s204_s6  ;;  %p1734_p9 = scmp.ne.s32.totalorder %s1727_s25, 0 }
  0x38   : > { %s1741_s23 = smov (!%p208_p5, %s207_s23), 25  ;;  %1065 = vmatprep.subr.bf16.mxu0 %v1324_v1  ;;  %1023 = vmatprep.mubr.msk.f32.mxu1 %vm1325_vm0, %v1326_v10  ;;  %v1075_v27 = vpack.c.bf16 %v316_v24, %v315_v23  ;;  %v318_v29 = vld [vmem:[%s1720_s1 + $0x58] sm:$0xff]  ;;  %v319_v33 = vld [vmem:[%s1720_s1 + $0x60] sm:$0xff]  ;;  %v320_v34 = vld [vmem:[%s1720_s1 + $0x68] sm:$0xff]  ;;  %s861_s9 = smul.u32 1664, %s1377_s19 }
  0x39   : > { %s830_s27 = sshll.u32 %s1741_s23, 3  ;;  %v1078_v32 = vpack.c.bf16 %v318_v29, %v317_v28  ;;  %v1081_v36 = vpack.c.bf16 %v320_v34, %v319_v33  ;;  %v321_v37 = vld [vmem:[%s1720_s1 + $0x70] sm:$0xff]  ;;  %v322_v38 = vld [vmem:[%s1720_s1 + $0x78] sm:$0xff]  ;;  %v455_v42 = vld [vmem:[#allocation2 + $0x10] sm:$0xff]  ;;  %s1640_s8 = scalar_lea.vmem [#allocation5], %s1110_s7 }
  0x3a   : > { %s1445_s30 = scalar_lea.vmem %s1719_s0, %s830_s27  ;;  %v1084_v39 = vpack.c.bf16 %v322_v38, %v321_v37  ;;  %v453_v40 = vld [vmem:[#allocation2] sm:$0xff]  ;;  %v454_v41 = vld [vmem:[#allocation2 + $0x8] sm:$0xff]  ;;  %v456_v44 = vld [vmem:[#allocation2 + $0x18] sm:$0xff]  ;;  %s750_s10 = sshll.u32 %s1640_s8, 4  ;;  %s1672_s10 = int_to_ptr.vmem [resolvable:$true] %s750_s10 }
  0x3b   : > { %v216_v4 = vld [vmem:[%s1445_s30 + $0x10] sm:$0xff]  ;;  %v214_v5 = vld [vmem:[%s1445_s30] sm:$0xff]  ;;  %v217_v7 = vld [vmem:[%s1445_s30 + $0x18] sm:$0xff]  ;;  %1067 = vmatpush3.bf16.msra.mxu0 %v1066_v13  ;;  %v1087_v43 = vpack.c.bf16 %v454_v41, %v453_v40  ;;  %v1090_v45 = vpack.c.bf16 %v456_v44, %v455_v42  ;;  %s1670_s13 = scalar_lea.hbm %s1723_s4, %s861_s9  ;;  %s1678_s19 = scalar_lea.sflag [#allocation4], %s204_s6 }
  0x3c   : > { %236 = vperm.xlu1 %1171, %v216_v4   ;;  %230 = vperm.xlu0 %1170, %v214_v5   ;;  %v215_v8 = vld [vmem:[%s1445_s30 + $0x8] sm:$0xff]  ;;  %v218_v16 = vld [vmem:[%s1445_s30 + $0x20] sm:$0xff]  ;;  %v221_v20 = vld [vmem:[%s1445_s30 + $0x38] sm:$0xff]  ;;  %v1327_v4 = vmov 1.0   ;;  %s1252_s14 = scalar_lea.vmem %s1672_s10, 1664  ;;  %s1328_s20 = smov [#allocation5]  }
  0x3d   : > { %v219_v15 = vld [vmem:[%s1445_s30 + $0x28] sm:$0xff]  ;;  %1068 = vmatprep.subr.bf16.mxu0 %v1324_v1  ;;  %v220_v21 = vld [vmem:[%s1445_s30 + $0x30] sm:$0xff]  ;;  %v222_v26 = vld [vmem:[%s1445_s30 + $0x40] sm:$0xff]  ;;  %1088 = vmatpush3.bf16.msra.mxu1 %v1087_v43  ;;  %p1253_p6 = scmp.ne.s32.totalorder %s1672_s10, %s1252_s14  ;;  %s1256_s22 = sshll.u32 %s1328_s20, 4  ;;  %s1257_s22 = int_to_ptr.vmem [resolvable:$false] %s1256_s22 }
  0x3e   : > { %v223_v25 = vld [vmem:[%s1445_s30 + $0x48] sm:$0xff]  ;;  %v225_v30 = vld [vmem:[%s1445_s30 + $0x58] sm:$0xff]  ;;  %v224_v31 = vld [vmem:[%s1445_s30 + $0x50] sm:$0xff]  ;;  %1089 = vmatprep.subr.bf16.mxu1 %v1324_v1  ;;  %s1258_s23 = scalar_lea.vmem %s1257_s22, 3328  ;;  %p1259_p2 = scmp.lt.s32.totalorder %s1672_s10, %s1257_s22 }
  0x3f   : > { %1070 = vmatpush3.bf16.msra.mxu0 %v1069_v17  ;;  %v226_v35 = vld [vmem:[%s1445_s30 + $0x60] sm:$0xff]  ;;  %v457_v46 = vld [vmem:[#allocation2 + $0x20] sm:$0xff]  ;;  %v458_v47 = vld [vmem:[#allocation2 + $0x28] sm:$0xff]  ;;  %p1254_p10 = pnand %p1253_p6, %p1734_p9  ;;  %p1260_p3 = scmp.lt.s32.totalorder %s1258_s23, %s1252_s14 }
  0x40   : > { %239 = vperm.xlu1 %1171, %v217_v7   ;;  %233 = vperm.xlu0 %1170, %v215_v8   ;;  %v1093_v48 = vpack.c.bf16 %v458_v47, %v457_v46  ;;  %v459_v49 = vld [vmem:[#allocation2 + $0x30] sm:$0xff]  ;;  %v460_v50 = vld [vmem:[#allocation2 + $0x38] sm:$0xff]  ;;  %v461_v52 = vld [vmem:[#allocation2 + $0x40] sm:$0xff] }
  0x41   : > { %1071 = vmatprep.subr.bf16.mxu0 %v1324_v1  ;;  %1091 = vmatpush3.bf16.msra.mxu1 %v1090_v45  ;;  %v1096_v51 = vpack.c.bf16 %v460_v50, %v459_v49  ;;  %v462_v53 = vld [vmem:[#allocation2 + $0x48] sm:$0xff]  ;;  %v463_v55 = vld [vmem:[#allocation2 + $0x50] sm:$0xff]  ;;  %v464_v56 = vld [vmem:[#allocation2 + $0x58] sm:$0xff]  ;;  %p1255_p12 = pneg %p1254_p10  ;;  %p1261_p4 = por %p1260_p3, %p1259_p2 }
  0x42   : > { %1092 = vmatprep.subr.bf16.mxu1 %v1324_v1  ;;  %v1099_v54 = vpack.c.bf16 %v462_v53, %v461_v52  ;;  %v1102_v57 = vpack.c.bf16 %v464_v56, %v463_v55  ;;  %v465_v58 = vld [vmem:[#allocation2 + $0x60] sm:$0xff]  ;;  %v466_v59 = vld [vmem:[#allocation2 + $0x68] sm:$0xff]  ;;  %v467_v61 = vld [vmem:[#allocation2 + $0x70] sm:$0xff] }
  0x43   : > { %1073 = vmatpush3.bf16.msra.mxu0 %v1072_v22  ;;  %v1105_v60 = vpack.c.bf16 %v466_v59, %v465_v58  ;;  %v468_v62 = vld [vmem:[#allocation2 + $0x78] sm:$0xff]  ;;  %v857_v43 = vld [vmem:[%s1722_s3] ss:$0 sm:$0xff]  ;;  %p1262_p7 = pnand %p1261_p4, %p1255_p12 }
  0x44   : > { %245 = vperm.xlu1 %1171, %v219_v15   ;;  %242 = vperm.xlu0 %1170, %v218_v16   ;;  %v1108_v63 = vpack.c.bf16 %v468_v62, %v467_v61 }
  0x45   : > { %1074 = vmatprep.subr.bf16.mxu0 %v1324_v1  ;;  %1094 = vmatpush3.bf16.msra.mxu1 %v1093_v48 }
  0x46   : > { %1095 = vmatprep.subr.bf16.mxu1 %v1324_v1 }
  0x47   : > { %1076 = vmatpush3.bf16.msra.mxu0 %v1075_v27 }
  0x48   : > { %251 = vperm.xlu1 %1171, %v221_v20   ;;  %248 = vperm.xlu0 %1170, %v220_v21  }
  0x49   : > { %1077 = vmatprep.subr.bf16.mxu0 %v1324_v1  ;;  %1097 = vmatpush3.bf16.msra.mxu1 %v1096_v51 }
  0x4a   : > { %1098 = vmatprep.subr.bf16.mxu1 %v1324_v1 }
  0x4b   : > { %1079 = vmatpush3.bf16.msra.mxu0 %v1078_v32 }
  0x4c   : > { %257 = vperm.xlu1 %1171, %v223_v25   ;;  %254 = vperm.xlu0 %1170, %v222_v26  }
  0x4d   : > { %1080 = vmatprep.subr.bf16.mxu0 %v1324_v1  ;;  %1100 = vmatpush3.bf16.msra.mxu1 %v1099_v54 }
  0x4e   : > { %1101 = vmatprep.subr.bf16.mxu1 %v1324_v1 }
  0x4f   : > { %1082 = vmatpush3.bf16.msra.mxu0 %v1081_v36 }
  0x50   : > { %263 = vperm.xlu1 %1171, %v225_v30   ;;  %260 = vperm.xlu0 %1170, %v224_v31  }
  0x51   : > { %1083 = vmatprep.subr.bf16.mxu0 %v1324_v1  ;;  %1103 = vmatpush3.bf16.msra.mxu1 %v1102_v57 }
  0x52   : > { %1104 = vmatprep.subr.bf16.mxu1 %v1324_v1 }
  0x53   : > { %1085 = vmatpush3.bf16.msra.mxu0 %v1084_v39 }
  0x54   : > { %266 = vperm.xlu0 %1170, %v226_v35  }
  0x55   : > { %1106 = vmatpush3.bf16.msra.mxu1 %v1105_v60 }
  0x56   : > { %1107 = vmatprep.subr.bf16.mxu1 %v1324_v1 }
  0x59   : > { %1109 = vmatpush3.bf16.msra.mxu1 %v1108_v63 }
  0xbb   : > { %v231_v3 = vpop.permute.xlu0 %230  ;;  %v237_v6 = vpop.permute.xlu1 %236 }
  0xbc   : > { %vm268_vm1 = vcmp.eq.s32.totalorder %v231_v3, %v228_v2  ;;  %vm270_vm3 = vcmp.eq.s32.totalorder %v237_v6, %v228_v2 }
  0xbd   : > { %953 = vmatmul.mubr.msk.f32.vlgmr.msra.gmra.mrb[0].mxu0 %vm268_vm1, %v1327_v4 }
  0xbe   : > { %955 = vmatprep.mubr.msk.f32.mxu0 %vm1325_vm0, %v1326_v10 }
  0xbf   : > { %v234_v5 = vpop.permute.xlu0 %233  ;;  %v240_v1 = vpop.permute.xlu1 %239 }
  0xc0   : > { %vm269_vm2 = vcmp.eq.s32.totalorder %v234_v5, %v228_v2  ;;  %vm271_vm4 = vcmp.eq.s32.totalorder %v240_v1, %v228_v2 }
  0xc1   : > { %956 = vmatmul.mubr.msk.f32.gmra.mrb[2].mxu0 %vm269_vm2, %v1327_v4 }
  0xc2   : > { %958 = vmatprep.mubr.msk.f32.mxu0 %vm1325_vm0, %v1326_v10 }
  0xc3   : > { %v243_v7 = vpop.permute.xlu0 %242  ;;  %v246_v8 = vpop.permute.xlu1 %245 }
  0xc4   : > { %vm272_vm5 = vcmp.eq.s32.totalorder %v243_v7, %v228_v2  ;;  %vm273_vm6 = vcmp.eq.s32.totalorder %v246_v8, %v228_v2 }
  0xc5   : > { %959 = vmatmul.mubr.msk.f32.gmra.mrb[4].mxu0 %vm270_vm3, %v1327_v4 }
  0xc6   : > { %961 = vmatprep.mubr.msk.f32.mxu0 %vm1325_vm0, %v1326_v10 }
  0xc7   : > { %v249_v9 = vpop.permute.xlu0 %248  ;;  %v252_v11 = vpop.permute.xlu1 %251 }
  0xc8   : > { %vm274_vm7 = vcmp.eq.s32.totalorder %v249_v9, %v228_v2  ;;  %vm275_vm8 = vcmp.eq.s32.totalorder %v252_v11, %v228_v2 }
  0xc9   : > { %962 = vmatmul.mubr.msk.f32.gmra.mrb[6].mxu0 %vm271_vm4, %v1327_v4 }
  0xca   : > { %964 = vmatprep.mubr.msk.f32.mxu0 %vm1325_vm0, %v1326_v10 }
  0xcb   : > { %v255_v12 = vpop.permute.xlu0 %254  ;;  %v258_v13 = vpop.permute.xlu1 %257 }
  0xcc   : > { %vm276_vm9 = vcmp.eq.s32.totalorder %v255_v12, %v228_v2  ;;  %vm277_vm10 = vcmp.eq.s32.totalorder %v258_v13, %v228_v2 }
  0xcd   : > { %965 = vmatmul.mubr.msk.f32.gmra.mrb[8].mxu0 %vm272_vm5, %v1327_v4 }
  0xce   : > { %967 = vmatprep.mubr.msk.f32.mxu0 %vm1325_vm0, %v1326_v10 }
  0xcf   : > { %v261_v14 = vpop.permute.xlu0 %260  ;;  %v264_v15 = vpop.permute.xlu1 %263 }
  0xd0   : > { %vm278_vm11 = vcmp.eq.s32.totalorder %v261_v14, %v228_v2  ;;  %vm279_vm12 = vcmp.eq.s32.totalorder %v264_v15, %v228_v2 }
  0xd1   : > { %968 = vmatmul.mubr.msk.f32.gmra.mrb[10].mxu0 %vm273_vm6, %v1327_v4 }
  0xd2   : > { %970 = vmatprep.mubr.msk.f32.mxu0 %vm1325_vm0, %v1326_v10 }
  0xd3   : > { %v267_v16 = vpop.permute.xlu0 %266 }
  0xd4   : > { %vm280_vm13 = vcmp.eq.s32.totalorder %v267_v16, %v228_v2 }
  0xd5   : > { %971 = vmatmul.mubr.msk.f32.gmra.mrb[12].mxu0 %vm274_vm7, %v1327_v4 }
  0xd6   : > { %973 = vmatprep.mubr.msk.f32.mxu0 %vm1325_vm0, %v1326_v10 }
  0xd9   : > { %974 = vmatmul.mubr.msk.f32.gmra.mrb[14].mxu0 %vm275_vm8, %v1327_v4 }
  0xda   : > { %976 = vmatprep.mubr.msk.f32.mxu0 %vm1325_vm0, %v1326_v10 }
  0xdd   : > { %977 = vmatmul.mubr.msk.f32.gmra.mrb[16].mxu0 %vm276_vm9, %v1327_v4 }
  0xde   : > { %979 = vmatprep.mubr.msk.f32.mxu0 %vm1325_vm0, %v1326_v10 }
  0xe1   : > { %980 = vmatmul.mubr.msk.f32.gmra.mrb[18].mxu0 %vm277_vm10, %v1327_v4 }
  0xe2   : > { %982 = vmatprep.mubr.msk.f32.mxu0 %vm1325_vm0, %v1326_v10 }
  0xe5   : > { %983 = vmatmul.mubr.msk.f32.gmra.mrb[20].mxu0 %vm278_vm11, %v1327_v4 }
  0xe6   : > { %985 = vmatprep.mubr.msk.f32.mxu0 %vm1325_vm0, %v1326_v10 }
  0xe9   : > { %986 = vmatmul.mubr.msk.f32.gmra.mrb[22].mxu0 %vm279_vm12, %v1327_v4 }
  0xea   : > { %988 = vmatprep.mubr.msk.f32.mxu0 %vm1325_vm0, %v1326_v10 }
  0xed   : > { %989 = vmatmul.mubr.msk.f32.gmra.mrb[24].mxu0 %vm280_vm13, %v1327_v4 }
 0x190   : > { %v389_v17 = vpop.f32.mrb[0].mxu0 }
 0x191   : > { %v954_v18 = vpop.f32.mrb[1].mxu0  ;;  %1024 = vmatmul.mubr.f32.vlgmr.msra.gmra.mrb[0].mxu1 %v389_v17 }
 0x192   : > { %1026 = vmatprep.mubr.msk.f32.mxu1 %vm1325_vm0, %v1326_v10 }
 0x194   : > { %v394_v19 = vpop.f32.mrb[2].mxu0 }
 0x195   : > { %v957_v20 = vpop.f32.mrb[3].mxu0  ;;  %1027 = vmatmul.mubr.f32.gmra.mrb[2].mxu1 %v394_v19 }
 0x196   : > { %1029 = vmatprep.mubr.msk.f32.mxu1 %vm1325_vm0, %v1326_v10 }
 0x198   : > { %v399_v21 = vpop.f32.mrb[4].mxu0 }
 0x199   : > { %v960_v22 = vpop.f32.mrb[5].mxu0  ;;  %1030 = vmatmul.mubr.f32.gmra.mrb[4].mxu1 %v399_v21 }
 0x19a   : > { %1032 = vmatprep.mubr.msk.f32.mxu1 %vm1325_vm0, %v1326_v10 }
 0x19c   : > { %v404_v23 = vpop.f32.mrb[6].mxu0 }
 0x19d   : > { %v963_v24 = vpop.f32.mrb[7].mxu0  ;;  %1033 = vmatmul.mubr.f32.gmra.mrb[6].mxu1 %v404_v23 }
 0x19e   : > { %1035 = vmatprep.mubr.msk.f32.mxu1 %vm1325_vm0, %v1326_v10 }
 0x1a0   : > { %v409_v25 = vpop.f32.mrb[8].mxu0 }
 0x1a1   : > { %v966_v26 = vpop.f32.mrb[9].mxu0  ;;  %1036 = vmatmul.mubr.f32.gmra.mrb[8].mxu1 %v409_v25 }
 0x1a2   : > { %1038 = vmatprep.mubr.msk.f32.mxu1 %vm1325_vm0, %v1326_v10 }
 0x1a4   : > { %v414_v27 = vpop.f32.mrb[10].mxu0 }
 0x1a5   : > { %v969_v28 = vpop.f32.mrb[11].mxu0  ;;  %1039 = vmatmul.mubr.f32.gmra.mrb[10].mxu1 %v414_v27 }
 0x1a6   : > { %1041 = vmatprep.mubr.msk.f32.mxu1 %vm1325_vm0, %v1326_v10 }
 0x1a8   : > { %v419_v29 = vpop.f32.mrb[12].mxu0 }
 0x1a9   : > { %v972_v30 = vpop.f32.mrb[13].mxu0  ;;  %1042 = vmatmul.mubr.f32.gmra.mrb[12].mxu1 %v419_v29 }
 0x1aa   : > { %1044 = vmatprep.mubr.msk.f32.mxu1 %vm1325_vm0, %v1326_v10 }
 0x1ac   : > { %v424_v31 = vpop.f32.mrb[14].mxu0 }
 0x1ad   : > { %v975_v32 = vpop.f32.mrb[15].mxu0  ;;  %1045 = vmatmul.mubr.f32.gmra.mrb[14].mxu1 %v424_v31 }
 0x1ae   : > { %1047 = vmatprep.mubr.msk.f32.mxu1 %vm1325_vm0, %v1326_v10 }
 0x1b0   : > { %v429_v33 = vpop.f32.mrb[16].mxu0 }
 0x1b1   : > { %v978_v34 = vpop.f32.mrb[17].mxu0  ;;  %1048 = vmatmul.mubr.f32.gmra.mrb[16].mxu1 %v429_v33 }
 0x1b2   : > { %1050 = vmatprep.mubr.msk.f32.mxu1 %vm1325_vm0, %v1326_v10 }
 0x1b4   : > { %v434_v35 = vpop.f32.mrb[18].mxu0 }
 0x1b5   : > { %v981_v36 = vpop.f32.mrb[19].mxu0  ;;  %1051 = vmatmul.mubr.f32.gmra.mrb[18].mxu1 %v434_v35 }
 0x1b6   : > { %1053 = vmatprep.mubr.msk.f32.mxu1 %vm1325_vm0, %v1326_v10 }
 0x1b8   : > { %v439_v37 = vpop.f32.mrb[20].mxu0 }
 0x1b9   : > { %v984_v38 = vpop.f32.mrb[21].mxu0  ;;  %1054 = vmatmul.mubr.f32.gmra.mrb[20].mxu1 %v439_v37 }
 0x1ba   : > { %1056 = vmatprep.mubr.msk.f32.mxu1 %vm1325_vm0, %v1326_v10 }
 0x1bc   : > { %v444_v39 = vpop.f32.mrb[22].mxu0 }
 0x1bd   : > { %v987_v40 = vpop.f32.mrb[23].mxu0  ;;  %1057 = vmatmul.mubr.f32.gmra.mrb[22].mxu1 %v444_v39 }
 0x1be   : > { %1059 = vmatprep.mubr.msk.f32.mxu1 %vm1325_vm0, %v1326_v10 }
 0x1c0   : > { %v449_v41 = vpop.f32.mrb[24].mxu0 }
 0x1c1   : > { %v990_v42 = vpop.f32.mrb[25].mxu0  ;;  %1060 = vmatmul.mubr.f32.gmra.mrb[24].mxu1 %v449_v41 }
 0x264   : > { %v542_v44 = vpop.f32.mrb[0].mxu1 }
 0x265   : > { %v543_v45 = vadd.f32 %v857_v43, %v542_v44  ;;  %v1025_v46 = vpop.f32.mrb[1].mxu1 }
 0x267   : > { %606 = vmax.xlane.f32.xlu1 %v543_v45 }
 0x268   : > { %v547_v47 = vpop.f32.mrb[2].mxu1 }
 0x269   : > { %v548_v48 = vadd.f32 %v857_v43, %v547_v47  ;;  %v1028_v49 = vpop.f32.mrb[3].mxu1 }
 0x26b   : > { %608 = vmax.xlane.f32.xlu0 %v548_v48 }
 0x26c   : > { %v552_v50 = vpop.f32.mrb[4].mxu1 }
 0x26d   : > { %v553_v51 = vadd.f32 %v857_v43, %v552_v50  ;;  %v1031_v52 = vpop.f32.mrb[5].mxu1 }
 0x26f   : > { %610 = vmax.xlane.f32.xlu0 %v553_v51 }
 0x270   : > { %v557_v10 = vpop.f32.mrb[6].mxu1 }
 0x271   : > { %v558_v53 = vadd.f32 %v857_v43, %v557_v10  ;;  %v1034_v54 = vpop.f32.mrb[7].mxu1 }
 0x273   : > { %612 = vmax.xlane.f32.xlu1 %v558_v53 }
 0x274   : > { %v562_v55 = vpop.f32.mrb[8].mxu1 }
 0x275   : > { %v563_v56 = vadd.f32 %v857_v43, %v562_v55  ;;  %v1037_v57 = vpop.f32.mrb[9].mxu1 }
 0x277   : > { %614 = vmax.xlane.f32.xlu0 %v563_v56 }
 0x278   : > { %v567_v58 = vpop.f32.mrb[10].mxu1 }
 0x279   : > { %v568_v59 = vadd.f32 %v857_v43, %v567_v58  ;;  %v1040_v60 = vpop.f32.mrb[11].mxu1 }
 0x27b   : > { %616 = vmax.xlane.f32.xlu1 %v568_v59 }
 0x27c   : > { %v572_v61 = vpop.f32.mrb[12].mxu1 }
 0x27d   : > { %v573_v62 = vadd.f32 %v857_v43, %v572_v61  ;;  %v1043_v63 = vpop.f32.mrb[13].mxu1 }
 0x27f   : > { %618 = vmax.xlane.f32.xlu0 %v573_v62 }
 0x280   : > { %v577_v0 = vpop.f32.mrb[14].mxu1 }
 0x281   : > { %v578_v2 = vadd.f32 %v857_v43, %v577_v0  ;;  %v1046_v3 = vpop.f32.mrb[15].mxu1 }
 0x283   : > { %620 = vmax.xlane.f32.xlu1 %v578_v2 }
 0x284   : > { %v582_v4 = vpop.f32.mrb[16].mxu1 }
 0x285   : > { %v1577_v5 = vadd.f32 %v857_v43, %v582_v4  ;;  %v1049_v6 = vpop.f32.mrb[17].mxu1 }
 0x287   : > { %622 = vmax.xlane.f32.xlu0 %v1577_v5 }
 0x288   : > { %v587_v1 = vpop.f32.mrb[18].mxu1 }
 0x289   : > { %v1580_v7 = vadd.f32 %v857_v43, %v587_v1  ;;  %v1052_v8 = vpop.f32.mrb[19].mxu1 }
 0x28b   : > { %624 = vmax.xlane.f32.xlu1 %v1580_v7 }
 0x28c   : > { %v592_v9 = vpop.f32.mrb[20].mxu1 }
 0x28d   : > { %v1583_v11 = vadd.f32 %v857_v43, %v592_v9  ;;  %v1055_v12 = vpop.f32.mrb[21].mxu1 }
 0x28f   : > { %626 = vmax.xlane.f32.xlu0 %v1583_v11 }
 0x290   : > { %v597_v13 = vpop.f32.mrb[22].mxu1 }
 0x291   : > { %v1586_v14 = vadd.f32 %v857_v43, %v597_v13  ;;  %v1058_v15 = vpop.f32.mrb[23].mxu1 }
 0x293   : > { %628 = vmax.xlane.f32.xlu1 %v1586_v14 }
 0x294   : > { %v602_v16 = vpop.f32.mrb[24].mxu1 }
 0x295   : > { %v1589_v17 = vadd.f32 %v857_v43, %v602_v16  ;;  %v1061_v18 = vpop.f32.mrb[25].mxu1 }
 0x297   : > { %630 = vmax.xlane.f32.xlu0 %v1589_v17 }
 0x2f4   : > { %v607_v19 = vpop.xlane.xlu1 %606 }
 0x2f5   : > { %v632_v20 = vsub.f32 %v543_v45, %v607_v19 }
 0x2f7   : > { %v645_v21 = vmul.f32 1.442695, %v632_v20 }
 0x2f8   : > { %v609_v22 = vpop.xlane.xlu0 %608 }
 0x2f9   : > { %1172 = vpow2.f32 %v645_v21  ;;  %v633_v23 = vsub.f32 %v548_v48, %v609_v22 }
 0x2fb   : > { %v647_v24 = vmul.f32 1.442695, %v633_v23 }
 0x2fc   : > { %v611_v25 = vpop.xlane.xlu0 %610 }
 0x2fd   : > { %1174 = vpow2.f32 %v647_v24  ;;  %v634_v26 = vsub.f32 %v553_v51, %v611_v25 }
 0x2ff   : > { %v649_v27 = vmul.f32 1.442695, %v634_v26 }
 0x300   : > { %v613_v28 = vpop.xlane.xlu1 %612 }
 0x301   : > { %1176 = vpow2.f32 %v649_v27  ;;  %v635_v29 = vsub.f32 %v558_v53, %v613_v28 }
 0x303   : > { %v1592_v30 = vpop.eup %1172  ;;  %v651_v31 = vmul.f32 1.442695, %v635_v29 }
 0x304   : > { %671 = vadd.xlane.f32.xlu1 %v1592_v30  ;;  %v615_v32 = vpop.xlane.xlu0 %614 }
 0x305   : > { %1178 = vpow2.f32 %v651_v31  ;;  %v636_v33 = vsub.f32 %v563_v56, %v615_v32 }
 0x307   : > { %v1595_v34 = vpop.eup %1174  ;;  %v653_v35 = vmul.f32 1.442695, %v636_v33 }
 0x308   : > { %v617_v36 = vpop.xlane.xlu1 %616  ;;  %673 = vadd.xlane.f32.xlu0 %v1595_v34 }
 0x309   : > { %1180 = vpow2.f32 %v653_v35  ;;  %v637_v37 = vsub.f32 %v568_v59, %v617_v36 }
 0x30b   : > { %v1598_v38 = vpop.eup %1176  ;;  %v655_v39 = vmul.f32 1.442695, %v637_v37 }
 0x30c   : > { %675 = vadd.xlane.f32.xlu1 %v1598_v38  ;;  %v619_v40 = vpop.xlane.xlu0 %618 }
 0x30d   : > { %1182 = vpow2.f32 %v655_v39  ;;  %v638_v41 = vsub.f32 %v573_v62, %v619_v40 }
 0x30f   : > { %v1601_v42 = vpop.eup %1178  ;;  %v657_v43 = vmul.f32 1.442695, %v638_v41 }
 0x310   : > { %v621_v44 = vpop.xlane.xlu1 %620  ;;  %677 = vadd.xlane.f32.xlu0 %v1601_v42 }
 0x311   : > { %1184 = vpow2.f32 %v657_v43  ;;  %v639_v45 = vsub.f32 %v578_v2, %v621_v44 }
 0x313   : > { %v1604_v46 = vpop.eup %1180  ;;  %v659_v47 = vmul.f32 1.442695, %v639_v45 }
 0x314   : > { %679 = vadd.xlane.f32.xlu1 %v1604_v46  ;;  %v623_v48 = vpop.xlane.xlu0 %622 }
 0x315   : > { %1186 = vpow2.f32 %v659_v47  ;;  %v640_v49 = vsub.f32 %v1577_v5, %v623_v48 }
 0x317   : > { %v1608_v50 = vpop.eup %1182  ;;  %v661_v51 = vmul.f32 1.442695, %v640_v49 }
 0x318   : > { %v625_v52 = vpop.xlane.xlu1 %624  ;;  %681 = vadd.xlane.f32.xlu0 %v1608_v50 }
 0x319   : > { %1188 = vpow2.f32 %v661_v51  ;;  %v641_v10 = vsub.f32 %v1580_v7, %v625_v52 }
 0x31b   : > { %v1612_v53 = vpop.eup %1184  ;;  %v663_v54 = vmul.f32 1.442695, %v641_v10 }
 0x31c   : > { %683 = vadd.xlane.f32.xlu1 %v1612_v53  ;;  %v627_v55 = vpop.xlane.xlu0 %626 }
 0x31d   : > { %1190 = vpow2.f32 %v663_v54  ;;  %v642_v56 = vsub.f32 %v1583_v11, %v627_v55 }
 0x31f   : > { %v1616_v57 = vpop.eup %1186  ;;  %v665_v58 = vmul.f32 1.442695, %v642_v56 }
 0x320   : > { %v629_v59 = vpop.xlane.xlu1 %628  ;;  %685 = vadd.xlane.f32.xlu0 %v1616_v57 }
 0x321   : > { %1192 = vpow2.f32 %v665_v58  ;;  %v643_v60 = vsub.f32 %v1586_v14, %v629_v59 }
 0x323   : > { %v1620_v61 = vpop.eup %1188  ;;  %v667_v62 = vmul.f32 1.442695, %v643_v60 }
 0x324   : > { %687 = vadd.xlane.f32.xlu1 %v1620_v61  ;;  %v631_v63 = vpop.xlane.xlu0 %630 }
 0x325   : > { %1194 = vpow2.f32 %v667_v62  ;;  %v644_v0 = vsub.f32 %v1589_v17, %v631_v63 }
 0x327   : > { %v1624_v2 = vpop.eup %1190  ;;  %v669_v3 = vmul.f32 1.442695, %v644_v0 }
 0x328   : > { %689 = vadd.xlane.f32.xlu0 %v1624_v2 }
 0x329   : > { %1196 = vpow2.f32 %v669_v3 }
 0x32b   : > { %v1627_v4 = vpop.eup %1192 }
 0x32c   : > { %691 = vadd.xlane.f32.xlu1 %v1627_v4 }
 0x32f   : > { %v1630_v5 = vpop.eup %1194 }
 0x330   : > { %693 = vadd.xlane.f32.xlu0 %v1630_v5 }
 0x333   : > { %v1633_v6 = vpop.eup %1196 }
 0x334   : > { %695 = vadd.xlane.f32.xlu1 %v1633_v6 }
 0x391   : > { %v672_v1 = vpop.xlane.xlu1 %671 }
 0x392   : > { %1198 = vrcp.f32 %v672_v1 }
 0x395   : > { %v674_v7 = vpop.xlane.xlu0 %673 }
 0x396   : > { %1200 = vrcp.f32 %v674_v7 }
 0x399   : > { %v676_v8 = vpop.xlane.xlu1 %675 }
 0x39a   : > { %1202 = vrcp.f32 %v676_v8 }
 0x39c   : > { %v1199_v9 = vpop.eup %1198 }
 0x39d   : > { %v698_v11 = vmul.f32 %v1199_v9, %v1592_v30  ;;  %v678_v12 = vpop.xlane.xlu0 %677 }
 0x39e   : > { %1204 = vrcp.f32 %v678_v12 }
 0x39f   : > { %723 = vst [vmem:[%s1640_s8] sm:$0xff] %v698_v11 }
 0x3a0   : > { %v1201_v13 = vpop.eup %1200 }
 0x3a1   : > { %v700_v14 = vmul.f32 %v1201_v13, %v1595_v34  ;;  %v680_v15 = vpop.xlane.xlu1 %679 }
 0x3a2   : > { %1206 = vrcp.f32 %v680_v15 }
 0x3a3   : > { %724 = vst [vmem:[%s1640_s8 + $0x8] sm:$0xff] %v700_v14 }
 0x3a4   : > { %v1203_v16 = vpop.eup %1202 }
 0x3a5   : > { %v702_v17 = vmul.f32 %v1203_v16, %v1598_v38  ;;  %v682_v18 = vpop.xlane.xlu0 %681 }
 0x3a6   : > { %1208 = vrcp.f32 %v682_v18 }
 0x3a7   : > { %725 = vst [vmem:[%s1640_s8 + $0x10] sm:$0xff] %v702_v17 }
 0x3a8   : > { %v1205_v19 = vpop.eup %1204 }
 0x3a9   : > { %v704_v20 = vmul.f32 %v1205_v19, %v1601_v42  ;;  %v684_v21 = vpop.xlane.xlu1 %683 }
 0x3aa   : > { %1210 = vrcp.f32 %v684_v21 }
 0x3ab   : > { %726 = vst [vmem:[%s1640_s8 + $0x18] sm:$0xff] %v704_v20 }
 0x3ac   : > { %v1207_v22 = vpop.eup %1206 }
 0x3ad   : > { %v706_v23 = vmul.f32 %v1207_v22, %v1604_v46  ;;  %v686_v24 = vpop.xlane.xlu0 %685 }
 0x3ae   : > { %1212 = vrcp.f32 %v686_v24 }
 0x3af   : > { %727 = vst [vmem:[%s1640_s8 + $0x20] sm:$0xff] %v706_v23 }
 0x3b0   : > { %v1209_v25 = vpop.eup %1208 }
 0x3b1   : > { %v708_v26 = vmul.f32 %v1209_v25, %v1608_v50  ;;  %v688_v27 = vpop.xlane.xlu1 %687 }
 0x3b2   : > { %1214 = vrcp.f32 %v688_v27 }
 0x3b3   : > { %728 = vst [vmem:[%s1640_s8 + $0x28] sm:$0xff] %v708_v26 }
 0x3b4   : > { %v1211_v28 = vpop.eup %1210 }
 0x3b5   : > { %v710_v29 = vmul.f32 %v1211_v28, %v1612_v53  ;;  %v690_v30 = vpop.xlane.xlu0 %689 }
 0x3b6   : > { %1216 = vrcp.f32 %v690_v30 }
 0x3b7   : > { %729 = vst [vmem:[%s1640_s8 + $0x30] sm:$0xff] %v710_v29 }
 0x3b8   : > { %v1213_v31 = vpop.eup %1212 }
 0x3b9   : > { %v712_v32 = vmul.f32 %v1213_v31, %v1616_v57  ;;  %v692_v33 = vpop.xlane.xlu1 %691 }
 0x3ba   : > { %1218 = vrcp.f32 %v692_v33 }
 0x3bb   : > { %730 = vst [vmem:[%s1640_s8 + $0x38] sm:$0xff] %v712_v32 }
 0x3bc   : > { %v1215_v34 = vpop.eup %1214 }
 0x3bd   : > { %v714_v35 = vmul.f32 %v1215_v34, %v1620_v61  ;;  %v694_v36 = vpop.xlane.xlu0 %693 }
 0x3be   : > { %1220 = vrcp.f32 %v694_v36 }
 0x3bf   : > { %731 = vst [vmem:[%s1640_s8 + $0x40] sm:$0xff] %v714_v35 }
 0x3c0   : > { %v1217_v37 = vpop.eup %1216 }
 0x3c1   : > { %v716_v38 = vmul.f32 %v1217_v37, %v1624_v2  ;;  %v696_v39 = vpop.xlane.xlu1 %695 }
 0x3c2   : > { %1222 = vrcp.f32 %v696_v39 }
 0x3c3   : > { %732 = vst [vmem:[%s1640_s8 + $0x48] sm:$0xff] %v716_v38 }
 0x3c4   : > { %v1219_v40 = vpop.eup %1218 }
 0x3c5   : > { %v718_v41 = vmul.f32 %v1219_v40, %v1627_v4 }
 0x3c7   : > { %733 = vst [vmem:[%s1640_s8 + $0x50] sm:$0xff] %v718_v41 }
 0x3c8   : > { %v1221_v42 = vpop.eup %1220 }
 0x3c9   : > { %v720_v43 = vmul.f32 %v1221_v42, %v1630_v5 }
 0x3cb   : > { %734 = vst [vmem:[%s1640_s8 + $0x58] sm:$0xff] %v720_v43 }
 0x3cc   : > { %v1223_v44 = vpop.eup %1222 }
 0x3cd   : > { %v722_v45 = vmul.f32 %v1223_v44, %v1633_v6 }
 0x3cf   : > { %735 = vst [vmem:[%s1640_s8 + $0x60] sm:$0xff] %v722_v45 }
 0x3d0   : > { %1265 = shalt.err (!%p1262_p7)
}
 0x3d1   : > { %s1266_s27 = scalar_lea.hbm %s1670_s13, 1664  ;;  %s1270_s30 = scalar_lea.hbm %s1723_s4, 3328 }
 0x3d2   : > { %p1267_p8 = scmp.ne.s32.totalorder %s1670_s13, %s1266_s27  ;;  %p1271_p1 = scmp.lt.u32.totalorder %s1670_s13, %s1723_s4 }
 0x3d3   : > { %p1272_p0 = scmp.lt.u32.totalorder %s1270_s30, %s1266_s27  ;;  %p1274_p6 = scmp.lt.u32.totalorder %s1266_s27, %s1670_s13 }
 0x3d4   : > { %p1268_p11 = pnand %p1267_p8, %p1734_p9 }
 0x3d5   : > { %p1273_p5 = por %p1272_p0, %p1271_p1 }
 0x3d6   : > { %p1269_p13 = pneg %p1268_p11 }
 0x3d7   : > { %p1275_p10 = por %p1274_p6, %p1273_p5 }
 0x3d9   : > { %p1276_p12 = pnand %p1275_p10, %p1269_p13 }
 0x3db   : > { %1279 = shalt.err (!%p1276_p12)
}
 0x3dc   : > { %s1329_s7 = smov 128   ;;  %s1330_s8 = smov 8  }
 0x3dd   : > { %1115 = dma.vmem_to_hbm [thread:$0]  (%p1734_p9), %s1672_s10, 1664, %s1670_s13, %s1678_s19, %s1329_s7, %s1329_s7, %s1330_s8  }
 0x3de PF: > { %p1127_p2 = scmp.ge.s32.totalorder %s1318_s18, 2  ;;  %s765_s9 = sand.u32 1, %s1306_s15  }
 0x3df   : > { %p1735_p3 = scmp.ne.s32.totalorder %s1728_s26, 0  ;;  %s766_s11 = scalar_lea.sflag [#allocation4], %s765_s9 }
 0x3e1   : > { %p1122_p4 = pnand %p1127_p2, %p1735_p3 }
 0x3e3   : > { %1301 = dma.done.wait (!%p1122_p4), %s766_s11, 1664  }
 0x3e4   : > { %1303 = vsyncadd (!%p1122_p4), %s766_s11, 4294965632  ;;  %p15_p7 = scmp.ge.s32.totalorder %s1381_s21, 4   ;;  %s1736_s15 = smov %s1310_s16 }
 0x3e5   : > { %s1737_s16 = smov %s1314_s17  ;;  %s1738_s17 = smov %s1392_s24 }
 0x3e6   : > { %s1739_s18 = smov %s1381_s21  ;;  %17 = sbr.rel (!%p15_p7) target bundleno = 4 (0x4), region = 76 }
 0x3ed   :  { %771 = vsyncpa [#allocation3], 1 }
 0x3ee   :  { %773 = vsyncpa [#allocation3 + $0x1], 1 }
 0x3ef   :  { %774 = vsyncpa [#allocation4], 1 }
 0x3f0   :  { %776 = vsyncpa [#allocation4 + $0x1], 1 }

</bundles_post_ra>
